<compile_context>
chip_gen: v5e
topology: v5e:2x2
jax: 0.10.0
libtpu: 0.0.40
codegen_flags: <defaults>
</compile_context>

<pallas_src>
import functools
import math

import jax
import jax.numpy as jnp
import numpy as np
from jax.experimental import pallas as pl
from jax.experimental.pallas import tpu as pltpu


# ---------------------------------------------------------------------------
# In-kernel helpers
# ---------------------------------------------------------------------------
def _neg_logsumexp_over_k(ll):
    """-logsumexp over the leading (K) axis of an (K, tile_n) f32 array.

    K is small and static, so this is an unrolled elementwise max/add tree
    (pure VPU work that co-issues with the EUP exp/log chain).
    Returns a (1, tile_n) array.
    """
    K = ll.shape[0]
    m = ll[0:1]
    for k in range(1, K):
        m = jnp.maximum(m, ll[k:k + 1])
    s = jnp.exp(ll[0:1] - m)
    for k in range(1, K):
        s += jnp.exp(ll[k:k + 1] - m)
    return -(m + jnp.log(s))


# ---------------------------------------------------------------------------
# Pallas kernels
# ---------------------------------------------------------------------------
def _diag_nll_kernel(d, pi_ref, mu_ref, sigma_ref, y_ref, out_ref):
    """Diagonal-covariance Gaussian mixture NLL for one batch tile.

    pi_ref:    (K, tn)
    mu_ref:    (d, K, tn)
    sigma_ref: (d, K, tn)
    y_ref:     (d, 1, tn)    (broadcast over K inside the kernel)
    out_ref:   (1, tn)
    """
    K, tn = pi_ref.shape
    quad = jnp.zeros((K, tn), jnp.float32)
    prod_sigma = jnp.ones((K, tn), jnp.float32)
    # d is small and static -> unrolled python loop; all math on (K, tn).
    for j in range(d):
        mu_j = mu_ref[j].astype(jnp.float32)          # (K, tn)
        s_j = sigma_ref[j].astype(jnp.float32)        # (K, tn)
        y_j = y_ref[j].astype(jnp.float32)            # (1, tn) -> broadcasts
        diff = y_j - mu_j
        quad += diff * diff / s_j                     # (x - mu)^2 / sigma
        prod_sigma *= s_j
    # log prod(2*pi*sigma) = log(prod sigma) + d * log(2*pi)   (single EUP log)
    log_norm = jnp.log(prod_sigma) + d * math.log(2.0 * math.pi)
    ll = -0.5 * quad - 0.5 * log_norm + jnp.log(pi_ref[...].astype(jnp.float32))
    out_ref[...] = _neg_logsumexp_over_k(ll)


def _general_nll_kernel(pi_ref, sigma_ref, mu_ref, y_ref, out_ref):
    """General (2-D, Cholesky-parameterized) Gaussian mixture NLL for one tile.

    pi_ref:    (K, tn)
    sigma_ref: (3, K, tn)   rows: L00, L10, L11
    mu_ref:    (2, K, tn)
    y_ref:     (2, 1, tn)
    out_ref:   (1, tn)
    """
    l00 = sigma_ref[0].astype(jnp.float32)
    l10 = sigma_ref[1].astype(jnp.float32)
    l11 = sigma_ref[2].astype(jnp.float32)
    d0 = y_ref[0].astype(jnp.float32) - mu_ref[0].astype(jnp.float32)
    d1 = y_ref[1].astype(jnp.float32) - mu_ref[1].astype(jnp.float32)

    # Solve (L L^T) z = dist via forward then backward substitution.
    # Two reciprocals instead of five divides.
    r00 = 1.0 / l00
    r11 = 1.0 / l11
    x0 = d0 * r00
    x1 = (d1 - l10 * x0) * r11
    z1 = x1 * r11
    z0 = (x0 - l10 * z1) * r00
    exponent = -0.5 * (d0 * z0 + d1 * z1)
    # log norm_factor = -0.5*log((2*pi)^2 * (l00*l11)^2) = -(log(2*pi)+log(l00*l11))
    log_norm = -(math.log(2.0 * math.pi) + jnp.log(l00 * l11))
    ll = exponent + log_norm + jnp.log(pi_ref[...].astype(jnp.float32))
    out_ref[...] = _neg_logsumexp_over_k(ll)


# ---------------------------------------------------------------------------
# Wrapper (MixtureLoss.forward equivalent)
# ---------------------------------------------------------------------------
def _pad_last(x, pad, value):
    if pad == 0:
        return x
    widths = [(0, 0)] * (x.ndim - 1) + [(0, pad)]
    return jnp.pad(x, widths, constant_values=value)


def mixture_loss(pi, sigma, mu, y, *, covariance_type="diagonal",
                 reduce=True, block_n=512):
    """pi: (N, K); mu: (N, K, d); y: (N, d);
       sigma: (N, K, d) for 'diagonal', (N, K, 3) for 'general' (d == 2)."""
    N, K = pi.shape
    d = mu.shape[-1]

    # Batch tiling: lane-dense tiles of the (padded) batch axis.
    if N <= block_n:
        tile_n = N
        n_pad = N
    else:
        tile_n = block_n                       # multiple of 128
        n_pad = ((N + tile_n - 1) // tile_n) * tile_n
    pad = n_pad - N
    grid = (n_pad // tile_n,)

    # Layout: K on sublanes, N on lanes.  Inputs stay in their native dtype;
    # upcast to f32 happens inside the kernel.
    pi_t = _pad_last(pi.T, pad, 1.0)                               # (K, n_pad)
    mu_t = _pad_last(jnp.transpose(mu, (2, 1, 0)), pad, 0.0)       # (d, K, n_pad)
    y_t = _pad_last(y.T[:, None, :], pad, 0.0)                     # (d, 1, n_pad)

    pi_spec = pl.BlockSpec((K, tile_n), lambda i: (0, i))
    y_spec = pl.BlockSpec((d, 1, tile_n), lambda i: (0, 0, i))
    out_spec = pl.BlockSpec((1, tile_n), lambda i: (0, i))
    out_shape = jax.ShapeDtypeStruct((1, n_pad), jnp.float32)
    cparams = pltpu.CompilerParams(
        dimension_semantics=("parallel",),
        vmem_limit_bytes=32 * 1024 * 1024,
    )

    if covariance_type == "diagonal":
        sigma_t = _pad_last(jnp.transpose(sigma, (2, 1, 0)), pad, 1.0)  # (d, K, n_pad)
        mu_spec = pl.BlockSpec((d, K, tile_n), lambda i: (0, 0, i))
        sig_spec = pl.BlockSpec((d, K, tile_n), lambda i: (0, 0, i))
        nll = pl.pallas_call(
            functools.partial(_diag_nll_kernel, d),
            out_shape=out_shape,
            grid=grid,
            in_specs=[pi_spec, mu_spec, sig_spec, y_spec],
            out_specs=out_spec,
            compiler_params=cparams,
        )(pi_t, mu_t, sigma_t, y_t)
    elif covariance_type == "general":
        assert d == 2 and sigma.shape[-1] == 3
        sigma_t = _pad_last(jnp.transpose(sigma, (2, 1, 0)), pad, 1.0)  # (3, K, n_pad)
        mu_spec = pl.BlockSpec((2, K, tile_n), lambda i: (0, 0, i))
        sig_spec = pl.BlockSpec((3, K, tile_n), lambda i: (0, 0, i))
        nll = pl.pallas_call(
            _general_nll_kernel,
            out_shape=out_shape,
            grid=grid,
            in_specs=[pi_spec, sig_spec, mu_spec, y_spec],
            out_specs=out_spec,
            compiler_params=cparams,
        )(pi_t, sigma_t, mu_t, y_t)
    else:
        raise ValueError(covariance_type)

    nll = nll[0, :N]                         # (N,) — drop batch padding
    if reduce:
        return jnp.mean(nll)                 # scalar, matches torch .mean()
    return nll


# ---------------------------------------------------------------------------
# Pure-JAX reference (direct transcription of the PyTorch code)
# ---------------------------------------------------------------------------
def _ref_loss(pi, sigma, mu, y, covariance_type, reduce):
    x = jnp.broadcast_to(y[:, None, :], mu.shape)
    dist = x - mu
    if covariance_type == "diagonal":
        norm_factor = jnp.prod(2 * np.pi * sigma, axis=2) ** (-0.5)
        exponent = -0.5 * jnp.sum(dist ** 2 / sigma, axis=-1)
    else:
        l00, l10, l11 = sigma[:, :, 0], sigma[:, :, 1], sigma[:, :, 2]
        det = (l00 * l11) ** 2
        norm_factor = ((2 * np.pi) ** 2 * det) ** (-0.5)
        x0 = dist[:, :, 0] / l00
        x1 = (dist[:, :, 1] - l10 * x0) / l11
        z1 = x1 / l11
        z0 = (x0 - l10 * z1) / l00
        exponent = -0.5 * (dist[:, :, 0] * z0 + dist[:, :, 1] * z1)
    ll = exponent + jnp.log(norm_factor) + jnp.log(pi)
    m = ll.max()                                   # global max, as in log_sum_exp
    out = -(m + jnp.log(jnp.sum(jnp.exp(ll - m), axis=1)))
    return jnp.mean(out) if reduce else out


# ---------------------------------------------------------------------------
if __name__ == "__main__":
    key = jax.random.PRNGKey(0)
    N, K, d = 16, 4, 2
    k1, k2, k3, k4, k5, k6 = jax.random.split(key, 6)

    pi = jax.nn.softmax(jax.random.normal(k1, (N, K), jnp.float32), axis=-1)
    mu = jax.random.normal(k2, (N, K, d), jnp.float32)
    y = jax.random.normal(k3, (N, d), jnp.float32)

    # --- diagonal covariance (module default) ---
    sigma_diag = jnp.exp(0.5 * jax.random.normal(k4, (N, K, d), jnp.float32))
    out_diag = jax.block_until_ready(
        mixture_loss(pi, sigma_diag, mu, y, covariance_type="diagonal", reduce=True))
    ref_diag = _ref_loss(pi, sigma_diag, mu, y, "diagonal", True)
    np.testing.assert_allclose(np.asarray(out_diag), np.asarray(ref_diag),
                               rtol=1e-4, atol=1e-5)

    # --- general covariance (Cholesky-parameterized, d = 2) ---
    l_diag = jnp.exp(0.3 * jax.random.normal(k5, (N, K, 2), jnp.float32))
    l_off = 0.3 * jax.random.normal(k6, (N, K, 1), jnp.float32)
    sigma_gen = jnp.concatenate(
        [l_diag[:, :, 0:1], l_off, l_diag[:, :, 1:2]], axis=-1)   # (N, K, 3)
    out_gen = jax.block_until_ready(
        mixture_loss(pi, sigma_gen, mu, y, covariance_type="general", reduce=True))
    ref_gen = _ref_loss(pi, sigma_gen, mu, y, "general", True)
    np.testing.assert_allclose(np.asarray(out_gen), np.asarray(ref_gen),
                               rtol=1e-4, atol=1e-5)

    # reduce=False path (per-sample NLL vector)
    out_vec = jax.block_until_ready(
        mixture_loss(pi, sigma_diag, mu, y, covariance_type="diagonal", reduce=False))
    ref_vec = _ref_loss(pi, sigma_diag, mu, y, "diagonal", False)
    np.testing.assert_allclose(np.asarray(out_vec), np.asarray(ref_vec),
                               rtol=1e-4, atol=1e-5)

    # larger batch that exercises the tiled/padded path (N > block_n)
    N2 = 1200
    j1, j2, j3, j4 = jax.random.split(jax.random.PRNGKey(1), 4)
    pi2 = jax.nn.softmax(jax.random.normal(j1, (N2, K), jnp.float32), axis=-1)
    mu2 = jax.random.normal(j2, (N2, K, d), jnp.float32)
    y2 = jax.random.normal(j3, (N2, d), jnp.float32)
    sig2 = jnp.exp(0.5 * jax.random.normal(j4, (N2, K, d), jnp.float32))
    out_big = jax.block_until_ready(
        mixture_loss(pi2, sig2, mu2, y2, covariance_type="diagonal", reduce=True))
    ref_big = _ref_loss(pi2, sig2, mu2, y2, "diagonal", True)
    np.testing.assert_allclose(np.asarray(out_big), np.asarray(ref_big),
                               rtol=1e-4, atol=1e-5)

    print("KERNEL_OK")
</pallas_src>

<mosaic_0001>
module attributes {stable_mosaic.version = 11 : i64} {
  func.func @_diag_nll_kernel(%arg0: i32, %arg1: memref<4x16xf32, #tpu.memory_space<vmem>>, %arg2: memref<2x4x16xf32, #tpu.memory_space<vmem>>, %arg3: memref<2x4x16xf32, #tpu.memory_space<vmem>>, %arg4: memref<2x1x16xf32, #tpu.memory_space<vmem>>, %arg5: memref<1x16xf32, #tpu.memory_space<vmem>>) attributes {dimension_semantics = [#tpu.dimension_semantics<parallel>], iteration_bounds = array<i64: 1>, scalar_prefetch = 0 : i64, scratch_operands = 0 : i64, tpu.core_type = #tpu.core_type<tc>, window_params = [{transform_indices = @transform_0, window_bounds = array<i64: 4, 16>}, {transform_indices = @transform_1, window_bounds = array<i64: 2, 4, 16>}, {transform_indices = @transform_2, window_bounds = array<i64: 2, 4, 16>}, {transform_indices = @transform_3, window_bounds = array<i64: 2, 1, 16>}, {transform_indices = @transform_4, window_bounds = array<i64: 1, 16>}]} {
    %cst = arith.constant 0.000000e+00 : f32
    %0 = vector.broadcast %cst : f32 to vector<4x16xf32>
    %cst_0 = arith.constant 1.000000e+00 : f32
    %1 = vector.broadcast %cst_0 : f32 to vector<4x16xf32>
    %c0 = arith.constant 0 : index
    %c0_1 = arith.constant 0 : index
    %c0_2 = arith.constant 0 : index
    %2 = vector.load %arg2[%c0, %c0_1, %c0_2] : memref<2x4x16xf32, #tpu.memory_space<vmem>>, vector<1x4x16xf32>
    %3 = vector.shape_cast %2 : vector<1x4x16xf32> to vector<4x16xf32>
    %c0_3 = arith.constant 0 : index
    %c0_4 = arith.constant 0 : index
    %c0_5 = arith.constant 0 : index
    %4 = vector.load %arg3[%c0_3, %c0_4, %c0_5] : memref<2x4x16xf32, #tpu.memory_space<vmem>>, vector<1x4x16xf32>
    %5 = vector.shape_cast %4 : vector<1x4x16xf32> to vector<4x16xf32>
    %c0_6 = arith.constant 0 : index
    %c0_7 = arith.constant 0 : index
    %c0_8 = arith.constant 0 : index
    %6 = vector.load %arg4[%c0_6, %c0_7, %c0_8] : memref<2x1x16xf32, #tpu.memory_space<vmem>>, vector<1x1x16xf32>
    %7 = vector.shape_cast %6 : vector<1x1x16xf32> to vector<1x16xf32>
    %8 = vector.broadcast %7 : vector<1x16xf32> to vector<4x16xf32>
    %9 = arith.subf %8, %3 : vector<4x16xf32>
    %10 = arith.mulf %9, %9 : vector<4x16xf32>
    %11 = arith.divf %10, %5 : vector<4x16xf32>
    %12 = arith.addf %0, %11 : vector<4x16xf32>
    %13 = arith.mulf %1, %5 : vector<4x16xf32>
    %c1 = arith.constant 1 : index
    %c0_9 = arith.constant 0 : index
    %c0_10 = arith.constant 0 : index
    %14 = vector.load %arg2[%c1, %c0_9, %c0_10] : memref<2x4x16xf32, #tpu.memory_space<vmem>>, vector<1x4x16xf32>
    %15 = vector.shape_cast %14 : vector<1x4x16xf32> to vector<4x16xf32>
    %c1_11 = arith.constant 1 : index
    %c0_12 = arith.constant 0 : index
    %c0_13 = arith.constant 0 : index
    %16 = vector.load %arg3[%c1_11, %c0_12, %c0_13] : memref<2x4x16xf32, #tpu.memory_space<vmem>>, vector<1x4x16xf32>
    %17 = vector.shape_cast %16 : vector<1x4x16xf32> to vector<4x16xf32>
    %c1_14 = arith.constant 1 : index
    %c0_15 = arith.constant 0 : index
    %c0_16 = arith.constant 0 : index
    %18 = vector.load %arg4[%c1_14, %c0_15, %c0_16] : memref<2x1x16xf32, #tpu.memory_space<vmem>>, vector<1x1x16xf32>
    %19 = vector.shape_cast %18 : vector<1x1x16xf32> to vector<1x16xf32>
    %20 = vector.broadcast %19 : vector<1x16xf32> to vector<4x16xf32>
    %21 = arith.subf %20, %15 : vector<4x16xf32>
    %22 = arith.mulf %21, %21 : vector<4x16xf32>
    %23 = arith.divf %22, %17 : vector<4x16xf32>
    %24 = arith.addf %12, %23 : vector<4x16xf32>
    %25 = arith.mulf %13, %17 : vector<4x16xf32>
    %26 = math.log %25 : vector<4x16xf32>
    %cst_17 = arith.constant 3.67575407 : f32
    %27 = vector.broadcast %cst_17 : f32 to vector<4x16xf32>
    %28 = arith.addf %26, %27 : vector<4x16xf32>
    %cst_18 = arith.constant -5.000000e-01 : f32
    %29 = vector.broadcast %cst_18 : f32 to vector<4x16xf32>
    %30 = arith.mulf %29, %24 : vector<4x16xf32>
    %cst_19 = arith.constant 5.000000e-01 : f32
    %31 = vector.broadcast %cst_19 : f32 to vector<4x16xf32>
    %32 = arith.mulf %31, %28 : vector<4x16xf32>
    %33 = arith.subf %30, %32 : vector<4x16xf32>
    %c0_20 = arith.constant 0 : index
    %c0_21 = arith.constant 0 : index
    %34 = vector.load %arg1[%c0_20, %c0_21] : memref<4x16xf32, #tpu.memory_space<vmem>>, vector<4x16xf32>
    %35 = math.log %34 : vector<4x16xf32>
    %36 = arith.addf %33, %35 : vector<4x16xf32>
    %37 = vector.extract_strided_slice %36 {offsets = [0, 0], sizes = [1, 16], strides = [1, 1]} : vector<4x16xf32> to vector<1x16xf32>
    %38 = vector.extract_strided_slice %36 {offsets = [1, 0], sizes = [1, 16], strides = [1, 1]} : vector<4x16xf32> to vector<1x16xf32>
    %39 = arith.maximumf %37, %38 : vector<1x16xf32>
    %40 = vector.extract_strided_slice %36 {offsets = [2, 0], sizes = [1, 16], strides = [1, 1]} : vector<4x16xf32> to vector<1x16xf32>
    %41 = arith.maximumf %39, %40 : vector<1x16xf32>
    %42 = vector.extract_strided_slice %36 {offsets = [3, 0], sizes = [1, 16], strides = [1, 1]} : vector<4x16xf32> to vector<1x16xf32>
    %43 = arith.maximumf %41, %42 : vector<1x16xf32>
    %44 = vector.extract_strided_slice %36 {offsets = [0, 0], sizes = [1, 16], strides = [1, 1]} : vector<4x16xf32> to vector<1x16xf32>
    %45 = arith.subf %44, %43 : vector<1x16xf32>
    %46 = math.exp %45 : vector<1x16xf32>
    %47 = vector.extract_strided_slice %36 {offsets = [1, 0], sizes = [1, 16], strides = [1, 1]} : vector<4x16xf32> to vector<1x16xf32>
    %48 = arith.subf %47, %43 : vector<1x16xf32>
    %49 = math.exp %48 : vector<1x16xf32>
    %50 = arith.addf %46, %49 : vector<1x16xf32>
    %51 = vector.extract_strided_slice %36 {offsets = [2, 0], sizes = [1, 16], strides = [1, 1]} : vector<4x16xf32> to vector<1x16xf32>
    %52 = arith.subf %51, %43 : vector<1x16xf32>
    %53 = math.exp %52 : vector<1x16xf32>
    %54 = arith.addf %50, %53 : vector<1x16xf32>
    %55 = vector.extract_strided_slice %36 {offsets = [3, 0], sizes = [1, 16], strides = [1, 1]} : vector<4x16xf32> to vector<1x16xf32>
    %56 = arith.subf %55, %43 : vector<1x16xf32>
    %57 = math.exp %56 : vector<1x16xf32>
    %58 = arith.addf %54, %57 : vector<1x16xf32>
    %59 = math.log %58 : vector<1x16xf32>
    %60 = arith.addf %43, %59 : vector<1x16xf32>
    %cst_22 = arith.constant 0.000000e+00 : f32
    %61 = vector.broadcast %cst_22 : f32 to vector<1x16xf32>
    %62 = arith.subf %61, %60 : vector<1x16xf32>
    %c0_23 = arith.constant 0 : index
    %c0_24 = arith.constant 0 : index
    %63 = vector.load %arg5[%c0_23, %c0_24] : memref<1x16xf32, #tpu.memory_space<vmem>>, vector<1x16xf32>
    tpu.vector_store %arg5[%c0_23, %c0_24], %62 {strides = array<i32>} : memref<1x16xf32, #tpu.memory_space<vmem>>, vector<1x16xf32>,
    return
  }
  func.func @transform_0(%arg0: i32) -> (i32, i32) {
    %c0_i32 = arith.constant 0 : i32
    %c0_i32_0 = arith.constant 0 : i32
    return %c0_i32, %arg0 : i32, i32
  }
  func.func @transform_1(%arg0: i32) -> (i32, i32, i32) {
    %c0_i32 = arith.constant 0 : i32
    %c0_i32_0 = arith.constant 0 : i32
    %c0_i32_1 = arith.constant 0 : i32
    return %c0_i32, %c0_i32_0, %arg0 : i32, i32, i32
  }
  func.func @transform_2(%arg0: i32) -> (i32, i32, i32) {
    %c0_i32 = arith.constant 0 : i32
    %c0_i32_0 = arith.constant 0 : i32
    %c0_i32_1 = arith.constant 0 : i32
    return %c0_i32, %c0_i32_0, %arg0 : i32, i32, i32
  }
  func.func @transform_3(%arg0: i32) -> (i32, i32, i32) {
    %c0_i32 = arith.constant 0 : i32
    %c0_i32_0 = arith.constant 0 : i32
    %c0_i32_1 = arith.constant 0 : i32
    return %c0_i32, %c0_i32_0, %arg0 : i32, i32, i32
  }
  func.func @transform_4(%arg0: i32) -> (i32, i32) {
    %c0_i32 = arith.constant 0 : i32
    %c0_i32_0 = arith.constant 0 : i32
    return %c0_i32, %arg0 : i32, i32
  }
}

</mosaic_0001>

<bundles_post_ra>
// kernel: tpu_custom_call.1
= control target key start
LH: loop header
LB: loop body
LE: loop exit
PB: predicated region body
PF: predicated region fallthrough
CT: control target
= control target key end

     0   :  { %9 = vsyncpa [#allocation3], 0  ;;  %s370_s0 = inlined_call_operand.hbm [shape: f32[4,16], index: 0, kind: input, shape index: {}]   ;;  %s371_s1 = inlined_call_operand.hbm [shape: f32[2,4,16], index: 1, kind: input, shape index: {}]   ;;  %s372_s2 = inlined_call_operand.hbm [shape: f32[2,4,16], index: 2, kind: input, shape index: {}]   ;;  %s373_s3 = inlined_call_operand.vmem [shape: f32[2,1,16], index: 3, kind: input, shape index: {}]   ;;  %s374_s4 = inlined_call_operand.hbm [shape: f32[1,16], index: 4, kind: output, shape index: {}]  }
   0x1   :  { %10 = vsyncpa [#allocation6], 0  ;;  %s27_s17 = sshll.u32 %s371_s1, 4  ;;  %s28_s17 = int_to_ptr.hbm [resolvable:$true] %s27_s17 }
   0x2   :  { %11 = vsyncpa [#allocation4], 0  ;;  %s319_s18 = smov [#allocation5]   ;;  %s17_s22 = sshll.u32 %s370_s0, 4  ;;  %s18_s22 = int_to_ptr.hbm [resolvable:$true] %s17_s22 }
   0x3   :  { %s29_s19 = sshll.u32 %s319_s18, 4  ;;  %s320_s23 = smov 64   ;;  %s30_s19 = int_to_ptr.vmem [resolvable:$true] %s29_s19 }
   0x4   :  { %s321_s24 = smov 4   ;;  %s322_s25 = smov [#allocation2]  }
   0x5   :  { %35 = dma.hbm_to_vmem [thread:$0]  %s28_s17, 128, %s30_s19, [#allocation6], %s320_s23, %s320_s23, %s321_s24  }
   0x6   :  { %s19_s26 = sshll.u32 %s322_s25, 4  ;;  %s40_s29 = sshll.u32 %s372_s2, 4  ;;  %s20_s26 = int_to_ptr.vmem [resolvable:$true] %s19_s26  ;;  %s41_s29 = int_to_ptr.hbm [resolvable:$true] %s40_s29 }
   0x7   :  { %22 = dma.hbm_to_vmem [thread:$0]  %s18_s22, 64, %s20_s26, [#allocation3]  }
   0x8   :  { %s323_s1 = smov [#allocation7]  }
   0x9   :  { %s42_s30 = sshll.u32 %s323_s1, 4  ;;  %s43_s30 = int_to_ptr.vmem [resolvable:$true] %s42_s30 }
   0xa   :  { %48 = dma.hbm_to_vmem [thread:$0]  %s41_s29, 128, %s43_s30, [#allocation6], %s320_s23, %s320_s23, %s321_s24  }
   0xb   :  { %313 = dma.done.wait [#allocation3], 64  }
   0xc   :  { %314 = vsyncadd [#allocation3], 4294967232 }
   0xd   :  { %315 = dma.done.wait [#allocation6], 256  }
   0xe   :  { %316 = vsyncadd [#allocation6], 4294967040  ;;  %v64_v0 = vld [vmem:[#allocation7] sm:$0xf]  ;;  %v90_v1 = vld [vmem:[#allocation7 + $0x4] sm:$0xf] }
   0xf   :  { %199 = vrcp.f32 %v64_v0  ;;  %v114_v2 = vmul.f32 %v90_v1, %v64_v0  ;;  %v197_v3 = vld [vmem:[%s373_s3] ss:$0 sm:$0xff]  ;;  %v63_v5 = vld [vmem:[#allocation5] sm:$0xf]  ;;  %v198_v7 = vld [vmem:[%s373_s3 + $0x1] ss:$0 sm:$0xff]  ;;  %vm76_vm0 = vweird.f32 %v64_v0  ;;  %vm103_vm2 = vweird.f32 %v90_v1 }
  0x10   :  { %201 = vrcp.f32 %v90_v1  ;;  %v80_v9 = vand.u32 2147483647, %v64_v0  ;;  %v82_v10 = vand.u32 2147483648, %v64_v0  ;;  %v88_v11 = vld [vmem:[#allocation5 + $0x4] sm:$0xf]  ;;  %v69_v12 = vsub.f32 %v197_v3, %v63_v5  ;;  %s324_s3 = smov [#allocation8]  }
  0x11   :  { %203 = vlog2.f32 %v114_v2  ;;  %v107_v15 = vand.u32 2147483647, %v90_v1  ;;  %v109_v16 = vand.u32 2147483648, %v90_v1  ;;  %v96_v19 = vsub.f32 %v198_v7, %v88_v11  ;;  %v121_v21 = vld [vmem:[#allocation2] sm:$0xf]  ;;  %s177_s7 = sshll.u32 %s324_s3, 4  ;;  %s178_s7 = int_to_ptr.vmem [resolvable:$true] %s177_s7 }
  0x12   :  { %vm81_vm5 = vcmp.eq.f32.partialorder %v80_v9, 8.507059e+37  ;;  %v83_v22 = vor.u32 1.1754944e-38, %v82_v10  ;;  %v70_v23 = vmul.f32 %v69_v12, %v69_v12  ;;  %205 = vlog2.f32 %v121_v21  ;;  %s179_s10 = sshll.u32 %s374_s4, 4  ;;  %s180_s10 = int_to_ptr.hbm [resolvable:$true] %s179_s10 }
  0x13   :  { %v110_v27 = vor.u32 1.1754944e-38, %v109_v16  ;;  %v97_v29 = vmul.f32 %v96_v19, %v96_v19  ;;  %vm108_vm7 = vcmp.eq.f32.partialorder %v107_v15, 8.507059e+37  ;;  %vm170_vm8 = vcmask 122880  }
  0x15   :  { %v200_v4 = vpop.eup %199 }
  0x16   :  { %v72_v6 = vmul.f32 %v200_v4, %v64_v0  ;;  %v202_v8 = vpop.eup %201  ;;  %vm77_vm1 = vweird.f32 %v200_v4 }
  0x17   :  { %v99_v14 = vmul.f32 %v202_v8, %v90_v1  ;;  %v204_v17 = vpop.eup %203  ;;  %vm104_vm3 = vweird.f32 %v202_v8  ;;  %vm78_vm4 = vmor %vm76_vm0, %vm77_vm1 }
  0x18   :  { %v73_v13 = vsub.f32 1.0, %v72_v6  ;;  %v116_v26 = vmul.f32 0.6931472, %v204_v17  ;;  %vm105_vm6 = vmor %vm103_vm2, %vm104_vm3  ;;  %v206_v37 = vpop.eup %205 }
  0x19   :  { %v100_v20 = vsub.f32 1.0, %v99_v14  ;;  %v123_v41 = vmul.f32 0.6931472, %v206_v37 }
  0x1a   :  { %v74_v18 = vmul.f32 %v200_v4, %v73_v13  ;;  %v117_v34 = vadd.f32 3.675754, %v116_v26 }
  0x1b   :  { %v101_v25 = vmul.f32 %v202_v8, %v100_v20 }
  0x1c   :  { %v75_v24 = vadd.f32 %v200_v4, %v74_v18  ;;  %v119_v39 = vmul.f32 0.5, %v117_v34 }
  0x1d   :  { %v102_v30 = vadd.f32 %v202_v8, %v101_v25 }
  0x1e   :  { %v79_v28 = vsel %vm78_vm4, %v200_v4, %v75_v24 }
  0x1f   :  { %v84_v31 = vsel %vm81_vm5, %v83_v22, %v79_v28  ;;  %v106_v33 = vsel %vm105_vm6, %v202_v8, %v102_v30 }
  0x20   :  { %v85_v32 = vmul.f32 %v84_v31, %v70_v23  ;;  %v111_v35 = vsel %vm108_vm7, %v110_v27, %v106_v33 }
  0x21   :  { %v112_v36 = vmul.f32 %v111_v35, %v97_v29 }
  0x23   :  { %v113_v38 = vadd.f32 %v112_v36, %v85_v32 }
  0x25   :  { %v118_v40 = vmul.f32 -0.5, %v113_v38 }
  0x27   :  { %v120_v42 = vsub.f32 %v118_v40, %v119_v39 }
  0x29   :  { %v124_v43 = vadd.f32 %v123_v41, %v120_v42 }
  0x2b   :  { %v126_v44 = vrot.slane %v124_v43, 1  ;;  %v129_v45 = vrot.slane %v124_v43, 2  ;;  %v132_v47 = vrot.slane %v124_v43, 3 }
  0x2d   :  { %v128_v46 = vmax.f32 %v124_v43, %v126_v44 }
  0x2f   :  { %v131_v48 = vmax.f32 %v128_v46, %v129_v45 }
  0x31   :  { %v134_v49 = vmax.f32 %v131_v48, %v132_v47 }
  0x33   :  { %v135_v50 = vsub.f32 %v124_v43, %v134_v49  ;;  %v139_v51 = vrot.slane %v134_v49, 7  ;;  %v148_v52 = vrot.slane %v134_v49, 6  ;;  %v157_v53 = vrot.slane %v134_v49, 5 }
  0x35   :  { %v136_v54 = vmul.f32 1.442695, %v135_v50  ;;  %v141_v55 = vsub.f32 %v124_v43, %v139_v51  ;;  %v150_v56 = vsub.f32 %v124_v43, %v148_v52  ;;  %v159_v57 = vsub.f32 %v124_v43, %v157_v53 }
  0x37   :  { %v142_v58 = vmul.f32 1.442695, %v141_v55  ;;  %v151_v59 = vmul.f32 1.442695, %v150_v56  ;;  %v160_v60 = vmul.f32 1.442695, %v159_v57  ;;  %207 = vpow2.f32 %v136_v54 }
  0x39   :  { %209 = vpow2.f32 %v142_v58 }
  0x3a   :  { %211 = vpow2.f32 %v151_v59 }
  0x3b   :  { %213 = vpow2.f32 %v160_v60 }
  0x3d   :  { %v208_v61 = vpop.eup %207 }
  0x3f   :  { %v210_v62 = vpop.eup %209 }
  0x40   :  { %v212_v63 = vpop.eup %211  ;;  %v145_v0 = vrot.slane %v210_v62, 1 }
  0x41   :  { %v214_v1 = vpop.eup %213  ;;  %v154_v2 = vrot.slane %v212_v63, 2 }
  0x42   :  { %v147_v3 = vadd.f32 %v208_v61, %v145_v0  ;;  %v163_v4 = vrot.slane %v214_v1, 3 }
  0x44   :  { %v156_v5 = vadd.f32 %v154_v2, %v147_v3 }
  0x46   :  { %v165_v6 = vadd.f32 %v163_v4, %v156_v5 }
  0x48   :  { %215 = vlog2.f32 %v165_v6 }
  0x4e   :  { %v216_v7 = vpop.eup %215 }
  0x4f   :  { %v167_v8 = vmul.f32 0.6931472, %v216_v7 }
  0x51   :  { %v168_v9 = vadd.f32 %v167_v8, %v134_v49 }
  0x53   :  { %v169_v10 = vsub.f32 0.0, %v168_v9 }
  0x55   :  { %171 = vst.msk [vmem:[#allocation8] sm:$0x1] %vm170_vm8, %v169_v10 }
  0x56   :  { %182 = dma.vmem_to_hbm [thread:$0]  %s178_s7, 16, %s180_s10, [#allocation4]  }
  0x57   :  { %317 = dma.done.wait [#allocation4], 16  }
  0x58   :  { %318 = vsyncadd [#allocation4], 4294967280 }
  0x59   :  { %187 = vsyncpa [#allocation3], 1 }
  0x5a   :  { %188 = vsyncpa [#allocation6], 1 }
  0x5b   :  { %189 = vsyncpa [#allocation4], 1 }

</bundles_post_ra>
